<compile_context>
chip_gen: v6e
topology: v6e:2x2x1
jax: 0.10.0
libtpu: 0.0.40
codegen_flags: <defaults>
</compile_context>

<pallas_src>
import functools

import jax
import jax.numpy as jnp
from jax import lax
from jax.experimental import pallas as pl
from jax.experimental.pallas import tpu as pltpu


def _pzy_kernel(n_components, y_ref, mu_tab_ref, lv_tab_ref, eps_ref,
                z_ref, mu_ref, lv_ref):
    # y_ref:      [TB, 1] int32 class indices for this batch tile
    # mu_tab_ref: [K, D]  f32 embedding table (VMEM resident across tiles)
    # lv_tab_ref: [K, D]  f32 embedding table (VMEM resident across tiles)
    # eps_ref:    [TB, D] f32 standard-normal noise
    y = y_ref[...]                                              # [TB, 1] i32
    tb = y.shape[0]
    col = lax.broadcasted_iota(jnp.int32, (tb, n_components), 1)
    onehot = (col == y).astype(jnp.float32)                     # [TB, K] exact 0/1

    # Embedding lookup as an exact one-hot matmul on the MXU.
    mu = jnp.dot(onehot, mu_tab_ref[...], preferred_element_type=jnp.float32)
    lv = jnp.dot(onehot, lv_tab_ref[...], preferred_element_type=jnp.float32)

    # Reparameterize: z = eps * exp(0.5 * logvar) + mu  (exp -> EUP slot).
    std = jnp.exp(0.5 * lv)
    z_ref[...] = eps_ref[...] * std + mu
    mu_ref[...] = mu
    lv_ref[...] = lv


def pzy_forward(y, eps, mu_table, logvar_table, *, batch_tile=None):
    """Pallas forward for PZYNetwork.  Returns (z, mu, logvar), each [B, D] f32."""
    batch = y.shape[0]
    k, d = mu_table.shape
    if batch_tile is None:
        batch_tile = batch if batch <= 256 else 256
    assert batch % batch_tile == 0, "batch must be divisible by batch_tile"
    grid = (batch // batch_tile,)

    y2 = y.astype(jnp.int32).reshape(batch, 1)

    kernel = functools.partial(_pzy_kernel, k)

    # Advisory cost hint: 2 one-hot matmuls + 3 elementwise ops, exp per element.
    cost = pl.CostEstimate(
        flops=2 * 2 * batch * k * d + 3 * batch * d,
        transcendentals=batch * d,
        bytes_accessed=4 * (2 * k * d + 4 * batch * d + batch),
    )

    z, mu, lv = pl.pallas_call(
        kernel,
        out_shape=(
            jax.ShapeDtypeStruct((batch, d), jnp.float32),
            jax.ShapeDtypeStruct((batch, d), jnp.float32),
            jax.ShapeDtypeStruct((batch, d), jnp.float32),
        ),
        grid_spec=pltpu.PrefetchScalarGridSpec(
            num_scalar_prefetch=0,
            grid=grid,
            in_specs=[
                pl.BlockSpec((batch_tile, 1), lambda i: (i, 0)),   # y indices
                pl.BlockSpec((k, d), lambda i: (0, 0)),            # mu table (resident)
                pl.BlockSpec((k, d), lambda i: (0, 0)),            # logvar table (resident)
                pl.BlockSpec((batch_tile, d), lambda i: (i, 0)),   # eps
            ],
            out_specs=[
                pl.BlockSpec((batch_tile, d), lambda i: (i, 0)),   # z
                pl.BlockSpec((batch_tile, d), lambda i: (i, 0)),   # mu
                pl.BlockSpec((batch_tile, d), lambda i: (i, 0)),   # logvar
            ],
        ),
        compiler_params=pltpu.CompilerParams(
            dimension_semantics=("parallel",),   # batch tiles shard across TCs (v7x megacore)
        ),
        cost_estimate=cost,
    )(y2, mu_table, logvar_table, eps)
    return z, mu, lv


def pzy_reference(y, eps, mu_table, logvar_table):
    """Pure-JAX reference with identical semantics (for verification)."""
    mu = mu_table[y]
    logvar = logvar_table[y]
    std = jnp.exp(0.5 * logvar)
    z = eps * std + mu
    return z, mu, logvar


if __name__ == "__main__":
    n_components = 8
    latent_dim = 16
    batch = 8

    key = jax.random.PRNGKey(0)
    k_mu, k_lv, k_y, k_eps = jax.random.split(key, 4)
    # nn.Embedding default init ~ N(0, 1)
    mu_table = jax.random.normal(k_mu, (n_components, latent_dim), jnp.float32)
    logvar_table = 0.1 * jax.random.normal(k_lv, (n_components, latent_dim), jnp.float32)
    y = jax.random.randint(k_y, (batch,), 0, n_components, dtype=jnp.int32)
    eps = jax.random.normal(k_eps, (batch, latent_dim), jnp.float32)

    z, mu, logvar = pzy_forward(y, eps, mu_table, logvar_table)
    jax.block_until_ready((z, mu, logvar))

    z_ref, mu_ref, lv_ref = pzy_reference(y, eps, mu_table, logvar_table)
    assert z.shape == (batch, latent_dim)
    assert mu.shape == (batch, latent_dim)
    assert logvar.shape == (batch, latent_dim)
    assert jnp.allclose(mu, mu_ref, atol=1e-6, rtol=1e-6)
    assert jnp.allclose(logvar, lv_ref, atol=1e-6, rtol=1e-6)
    assert jnp.allclose(z, z_ref, atol=1e-5, rtol=1e-5)

    print("KERNEL_OK")
</pallas_src>

<mosaic_0001>
module attributes {stable_mosaic.version = 11 : i64} {
  func.func @_pzy_kernel(%arg0: i32, %arg1: memref<8x1xi32, #tpu.memory_space<vmem>>, %arg2: memref<8x16xf32, #tpu.memory_space<vmem>>, %arg3: memref<8x16xf32, #tpu.memory_space<vmem>>, %arg4: memref<8x16xf32, #tpu.memory_space<vmem>>, %arg5: memref<8x16xf32, #tpu.memory_space<vmem>>, %arg6: memref<8x16xf32, #tpu.memory_space<vmem>>, %arg7: memref<8x16xf32, #tpu.memory_space<vmem>>) attributes {dimension_semantics = [#tpu.dimension_semantics<parallel>], iteration_bounds = array<i64: 1>, scalar_prefetch = 0 : i64, scratch_operands = 0 : i64, tpu.core_type = #tpu.core_type<tc>, window_params = [{transform_indices = @transform_0, window_bounds = array<i64: 8, 1>}, {pipeline_mode = #tpu.pipeline_mode<synchronous>, transform_indices = @transform_1, window_bounds = array<i64: 8, 16>}, {pipeline_mode = #tpu.pipeline_mode<synchronous>, transform_indices = @transform_2, window_bounds = array<i64: 8, 16>}, {transform_indices = @transform_3, window_bounds = array<i64: 8, 16>}, {transform_indices = @transform_4, window_bounds = array<i64: 8, 16>}, {transform_indices = @transform_5, window_bounds = array<i64: 8, 16>}, {transform_indices = @transform_6, window_bounds = array<i64: 8, 16>}]} {
    %c0 = arith.constant 0 : index
    %c0_0 = arith.constant 0 : index
    %0 = vector.load %arg1[%c0, %c0_0] : memref<8x1xi32, #tpu.memory_space<vmem>>, vector<8x1xi32>
    %1 = tpu.iota {dimensions = array<i32: 1>} : vector<8x8xi32>
    %2 = vector.broadcast %0 : vector<8x1xi32> to vector<8x8xi32>
    %3 = arith.cmpi eq, %1, %2 : vector<8x8xi32>
    %4 = arith.extui %3 : vector<8x8xi1> to vector<8x8xi32>
    %5 = arith.sitofp %4 : vector<8x8xi32> to vector<8x8xf32>
    %c0_1 = arith.constant 0 : index
    %c0_2 = arith.constant 0 : index
    %6 = vector.load %arg2[%c0_1, %c0_2] : memref<8x16xf32, #tpu.memory_space<vmem>>, vector<8x16xf32>
    %cst = arith.constant dense<0.000000e+00> : vector<8x16xf32>
    %7 = tpu.matmul %5, %6, %cst {dimension_numbers = #tpu.dot_dimension_numbers<[1], [0], [0], [1], [0, 0, 1, 1], [], []>} : vector<8x8xf32>, vector<8x16xf32>, vector<8x16xf32> -> vector<8x16xf32>
    %c0_3 = arith.constant 0 : index
    %c0_4 = arith.constant 0 : index
    %8 = vector.load %arg3[%c0_3, %c0_4] : memref<8x16xf32, #tpu.memory_space<vmem>>, vector<8x16xf32>
    %cst_5 = arith.constant dense<0.000000e+00> : vector<8x16xf32>
    %9 = tpu.matmul %5, %8, %cst_5 {dimension_numbers = #tpu.dot_dimension_numbers<[1], [0], [0], [1], [0, 0, 1, 1], [], []>} : vector<8x8xf32>, vector<8x16xf32>, vector<8x16xf32> -> vector<8x16xf32>
    %cst_6 = arith.constant 5.000000e-01 : f32
    %10 = vector.broadcast %cst_6 : f32 to vector<8x16xf32>
    %11 = arith.mulf %10, %9 : vector<8x16xf32>
    %12 = math.exp %11 : vector<8x16xf32>
    %c0_7 = arith.constant 0 : index
    %c0_8 = arith.constant 0 : index
    %13 = vector.load %arg4[%c0_7, %c0_8] : memref<8x16xf32, #tpu.memory_space<vmem>>, vector<8x16xf32>
    %14 = arith.mulf %13, %12 : vector<8x16xf32>
    %15 = arith.addf %14, %7 : vector<8x16xf32>
    %c0_9 = arith.constant 0 : index
    %c0_10 = arith.constant 0 : index
    %16 = vector.load %arg5[%c0_9, %c0_10] : memref<8x16xf32, #tpu.memory_space<vmem>>, vector<8x16xf32>
    tpu.vector_store %arg5[%c0_9, %c0_10], %15 {strides = array<i32>} : memref<8x16xf32, #tpu.memory_space<vmem>>, vector<8x16xf32>,
    %c0_11 = arith.constant 0 : index
    %c0_12 = arith.constant 0 : index
    %17 = vector.load %arg6[%c0_11, %c0_12] : memref<8x16xf32, #tpu.memory_space<vmem>>, vector<8x16xf32>
    tpu.vector_store %arg6[%c0_11, %c0_12], %7 {strides = array<i32>} : memref<8x16xf32, #tpu.memory_space<vmem>>, vector<8x16xf32>,
    %c0_13 = arith.constant 0 : index
    %c0_14 = arith.constant 0 : index
    %18 = vector.load %arg7[%c0_13, %c0_14] : memref<8x16xf32, #tpu.memory_space<vmem>>, vector<8x16xf32>
    tpu.vector_store %arg7[%c0_13, %c0_14], %9 {strides = array<i32>} : memref<8x16xf32, #tpu.memory_space<vmem>>, vector<8x16xf32>,
    return
  }
  func.func @transform_0(%arg0: i32) -> (i32, i32) {
    %c0_i32 = arith.constant 0 : i32
    %c0_i32_0 = arith.constant 0 : i32
    return %arg0, %c0_i32 : i32, i32
  }
  func.func @transform_1(%arg0: i32) -> (i32, i32) {
    %c0_i32 = arith.constant 0 : i32
    %c0_i32_0 = arith.constant 0 : i32
    %c0_i32_1 = arith.constant 0 : i32
    return %c0_i32, %c0_i32_0 : i32, i32
  }
  func.func @transform_2(%arg0: i32) -> (i32, i32) {
    %c0_i32 = arith.constant 0 : i32
    %c0_i32_0 = arith.constant 0 : i32
    %c0_i32_1 = arith.constant 0 : i32
    return %c0_i32, %c0_i32_0 : i32, i32
  }
  func.func @transform_3(%arg0: i32) -> (i32, i32) {
    %c0_i32 = arith.constant 0 : i32
    %c0_i32_0 = arith.constant 0 : i32
    return %arg0, %c0_i32 : i32, i32
  }
  func.func @transform_4(%arg0: i32) -> (i32, i32) {
    %c0_i32 = arith.constant 0 : i32
    %c0_i32_0 = arith.constant 0 : i32
    return %arg0, %c0_i32 : i32, i32
  }
  func.func @transform_5(%arg0: i32) -> (i32, i32) {
    %c0_i32 = arith.constant 0 : i32
    %c0_i32_0 = arith.constant 0 : i32
    return %arg0, %c0_i32 : i32, i32
  }
  func.func @transform_6(%arg0: i32) -> (i32, i32) {
    %c0_i32 = arith.constant 0 : i32
    %c0_i32_0 = arith.constant 0 : i32
    return %arg0, %c0_i32 : i32, i32
  }
}

</mosaic_0001>

<bundles_post_ra>
// kernel: tpu_custom_call.1
= control target key start
LH: loop header
LB: loop body
LE: loop exit
PB: predicated region body
PF: predicated region fallthrough
CT: control target
= control target key end

     0   :  { %12 = vsyncpa [#allocation3], 0  ;;  %s457_s0 = inlined_call_operand.vmem [shape: s32[8,1], index: 0, kind: input, shape index: {}]   ;;  %s458_s1 = inlined_call_operand.vmem [shape: f32[8,16], index: 1, kind: input, shape index: {}]   ;;  %s459_s2 = inlined_call_operand.hbm [shape: f32[8,16], index: 2, kind: input, shape index: {}]   ;;  %s460_s3 = inlined_call_operand.hbm [shape: f32[8,16], index: 3, kind: input, shape index: {}]   ;;  %s461_s4 = inlined_call_operand.hbm [shape: f32[8,16], index: 4, kind: output, shape index: {0}]   ;;  %s462_s5 = inlined_call_operand.hbm [shape: f32[8,16], index: 5, kind: output, shape index: {1}]   ;;  %s463_s6 = inlined_call_operand.hbm [shape: f32[8,16], index: 6, kind: output, shape index: {2}]  }
   0x1   :  { %13 = vsyncpa [#allocation6], 0 }
   0x2   :  { %14 = vsyncpa [#allocation4], 0 }
   0x3   :  { %15 = vsyncpa [#allocation9], 0  ;;  %s390_s21 = smov [#allocation2]   ;;  %s391_s23 = smov [#allocation5]  }
   0x4   :  { %s26_s22 = sshll.u32 %s390_s21, 4  ;;  %s36_s24 = sshll.u32 %s391_s23, 4  ;;  %s27_s22 = int_to_ptr.vmem [resolvable:$true] %s26_s22  ;;  %s37_s24 = int_to_ptr.vmem [resolvable:$true] %s36_s24 }
   0x5   :  { %s290_s25 = scalar_lea.vmem %s27_s22, 128  ;;  %p295_p1 = scmp.lt.s32.totalorder %s27_s22, %s27_s22 }
   0x6   :  { %p291_p0 = scmp.ne.s32.totalorder %s27_s22, %s290_s25  ;;  %p296_p2 = scmp.lt.s32.totalorder %s290_s25, %s290_s25 }
   0x8   :  { %p297_p3 = por %p296_p2, %p295_p1 }
   0xa   :  { %p298_p4 = pnand %p297_p3, %p291_p0 }
   0xc   :  { %301 = shalt.err (!%p298_p4)
}
   0xd   :  { %29 = dma.hbm_to_vmem [thread:$0]  %s459_s2, 128, %s27_s22, [#allocation3]  }
   0xe   :  { %s310_s28 = scalar_lea.vmem %s37_s24, 128  ;;  %p315_p6 = scmp.lt.s32.totalorder %s37_s24, %s37_s24 }
   0xf   :  { %p311_p5 = scmp.ne.s32.totalorder %s37_s24, %s310_s28  ;;  %p316_p7 = scmp.lt.s32.totalorder %s310_s28, %s310_s28 }
  0x11   :  { %p317_p8 = por %p316_p7, %p315_p6 }
  0x13   :  { %p318_p9 = pnand %p317_p8, %p311_p5 }
  0x15   :  { %321 = shalt.err (!%p318_p9)
}
  0x16   :  { %39 = dma.hbm_to_vmem [thread:$0]  %s460_s3, 128, %s37_s24, [#allocation6]  }
  0x17   :  { %382 = dma.done.wait [#allocation3], 128  }
  0x18   :  { %383 = vsyncadd [#allocation3], 4294967168 }
  0x19   :  { %384 = dma.done.wait [#allocation6], 128  }
  0x1a   :  { %385 = vsyncadd [#allocation6], 4294967168  ;;  %v392_v0 = vmov 0   ;;  %v393_v1 = vmov 0.0   ;;  %vm394_vm0 = vmmov 0   ;;  %v46_v2 = vld [vmem:[%s457_s0] sm:$0xff]  ;;  %v47_v5 = vlaneseq }
  0x1b   :  { %279 = vset.pattern.permute.xlu0 %v392_v0  ;;  %261 = vmatprep.subr.mxu0 %v393_v1  ;;  %v55_v3 = vld [vmem:[%s458_s1] sm:$0xff]  ;;  %vm56_vm1 = vcmask 64512   ;;  %s395_s3 = smov [#allocation8]   ;;  %s396_s11 = smov [#allocation10]   ;;  %vm207_vm3 = vcmask 130048  }
  0x1c   :  { %266 = vmatprep.subr.mxu1 %v393_v1  ;;  %263 = vmatprep.mubr.msk.f32.mxu0 %vm394_vm0, %v393_v1  ;;  %v130_v4 = vld [vmem:[#allocation2] sm:$0xff]  ;;  %v48_v6 = vand.u32 127, %v47_v5  ;;  %s227_s10 = sshll.u32 %s395_s3, 4  ;;  %s237_s0 = sshll.u32 %s396_s11, 4  ;;  %s228_s10 = int_to_ptr.vmem [resolvable:$true] %s227_s10  ;;  %s238_s0 = int_to_ptr.vmem [resolvable:$true] %s237_s0 }
  0x1d   :  { %268 = vmatprep.mubr.msk.f32.mxu1 %vm394_vm0, %v393_v1  ;;  %50 = vperm.xlu0 %279, %v46_v2   ;;  %s322_s1 = scalar_lea.vmem %s228_s10, 128  ;;  %p327_p11 = scmp.lt.s32.totalorder %s228_s10, %s228_s10 }
  0x1e   :  { %262 = vmatpush3.msra.mxu0 %v55_v3  ;;  %267 = vmatpush3.msra.mxu1 %v130_v4  ;;  %p323_p10 = scmp.ne.s32.totalorder %s228_s10, %s322_s1  ;;  %p328_p12 = scmp.lt.s32.totalorder %s322_s1, %s322_s1 }
  0x20   :  { %p329_p13 = por %p328_p12, %p327_p11 }
  0x22   :  { %p330_p0 = pnand %p329_p13, %p323_p10 }
  0x98   :  { %v51_v7 = vpop.permute.xlu0 %50 }
  0x99   :  { %vm52_vm2 = vcmp.eq.s32.totalorder %v48_v6, %v51_v7 }
  0x9a   :  { %v254_v8 = vsel %vm52_vm2, 1.0, %v393_v1 }
  0x9b   :  { %264 = vmatmul.mubr.msk.f32.vlgmr.msra.gmra.mxu0 %vm56_vm1, %v254_v8  ;;  %269 = vmatmul.mubr.msk.f32.vlgmr.msra.gmra.mxu1 %vm56_vm1, %v254_v8 }
 0x15b   :  { %v126_v9 = vpop.f32.mrf.mxu0  ;;  %v197_v10 = vpop.f32.mrf.mxu1 }
 0x15c   :  { %v201_v11 = vmul.f32 0.5, %v197_v10  ;;  %210 = vst.msk [vmem:[#allocation10] sm:$0xff] %vm207_vm3, %v197_v10  ;;  %209 = vst.msk [vmem:[#allocation8] sm:$0xff] %vm207_vm3, %v126_v9 }
 0x15d   :  { %v265_v12 = vpop.f32.mrf.mxu0  ;;  %v270_v13 = vpop.f32.mrf.mxu1 }
 0x15e   :  { %333 = shalt.err (!%p330_p0)
}
 0x15f   :  { %230 = dma.vmem_to_hbm [thread:$0]  %s228_s10, 128, %s462_s5, [#allocation9]   ;;  %v202_v14 = vmul.f32 1.442695, %v201_v11 }
 0x160   :  { %s342_s14 = scalar_lea.vmem %s238_s0, 128  ;;  %p347_p2 = scmp.lt.s32.totalorder %s238_s0, %s238_s0 }
 0x161   :  { %p343_p1 = scmp.ne.s32.totalorder %s238_s0, %s342_s14  ;;  %p348_p3 = scmp.lt.s32.totalorder %s342_s14, %s342_s14 }
 0x163   :  { %p349_p4 = por %p348_p3, %p347_p2 }
 0x165   :  { %p350_p5 = pnand %p349_p4, %p343_p1 }
 0x167   :  { %353 = shalt.err (!%p350_p5)
}
 0x168   :  { %240 = dma.vmem_to_hbm [thread:$0]  %s238_s0, 128, %s463_s6, [#allocation9]   ;;  %280 = vpow2.f32 %v202_v14  ;;  %v204_v15 = vld [vmem:[#allocation5] sm:$0xff] }
 0x169   :  { %s397_s17 = smov [#allocation7]  }
 0x16a   :  { %s217_s18 = sshll.u32 %s397_s17, 4  ;;  %s218_s18 = int_to_ptr.vmem [resolvable:$true] %s217_s18 }
 0x16b   :  { %s362_s5 = scalar_lea.vmem %s218_s18, 128  ;;  %p367_p7 = scmp.lt.s32.totalorder %s218_s18, %s218_s18 }
 0x16c   :  { %p363_p6 = scmp.ne.s32.totalorder %s218_s18, %s362_s5  ;;  %p368_p8 = scmp.lt.s32.totalorder %s362_s5, %s362_s5 }
 0x16e   :  { %p369_p9 = por %p368_p8, %p367_p7 }
 0x170   :  { %p370_p10 = pnand %p369_p9, %p363_p6 }
 0x175   :  { %v281_v16 = vpop.eup %280 }
 0x176   :  { %v205_v17 = vmul.f32 %v281_v16, %v204_v15 }
 0x178   :  { %v206_v18 = vadd.f32 %v205_v17, %v126_v9 }
 0x17a   :  { %208 = vst.msk [vmem:[#allocation7] sm:$0xff] %vm207_vm3, %v206_v18 }
 0x17b   :  { %373 = shalt.err (!%p370_p10)
}
 0x17c   :  { %220 = dma.vmem_to_hbm [thread:$0]  %s218_s18, 128, %s461_s4, [#allocation4]  }
 0x17d   :  { %386 = dma.done.wait [#allocation4], 128  }
 0x17e   :  { %387 = vsyncadd [#allocation4], 4294967168 }
 0x17f   :  { %388 = dma.done.wait [#allocation9], 256  }
 0x180   :  { %389 = vsyncadd [#allocation9], 4294967040 }
 0x181   :  { %250 = vsyncpa [#allocation3], 1 }
 0x182   :  { %251 = vsyncpa [#allocation6], 1 }
 0x183   :  { %252 = vsyncpa [#allocation4], 1 }
 0x184   :  { %253 = vsyncpa [#allocation9], 1 }

</bundles_post_ra>
